<compile_context>
chip_gen: v6e
topology: v6e:2x2x1
jax: 0.10.0
libtpu: 0.0.40
codegen_flags: <defaults>
</compile_context>

<pallas_src>
import math

import jax
import jax.numpy as jnp
import numpy as np
from jax.experimental import pallas as pl
from jax.experimental.pallas import tpu as pltpu


def _cross_op_kernel(tp_ref, sp_ref, wt_ref, ws_ref, b_ref, inter_ref, agg_ref):
    # tp_ref:    (1, K*K*C, HWp)      target patch matrix for this b
    # sp_ref:    (1, S, K*K*C, HWp)   support patch matrices for this b
    # wt_ref:    (Co, K*K*C)          target-half conv weight (tap-major)
    # ws_ref:    (Co, K*K*C)          support-half conv weight (tap-major)
    # b_ref:     (Co, 1)              bias
    # inter_ref: (1, S, Co, HWp)      per-support interactions (lane-dense)
    # agg_ref:   (1, Co, HWp)         mean over supports (lane-dense)
    _, S, _, HWp = sp_ref.shape
    Co = wt_ref.shape[0]

    # Target half + bias: computed once per batch element, shared by all
    # S supports (the concatenated conv is linear, so it splits exactly).
    base = jnp.dot(wt_ref[...], tp_ref[0],
                   preferred_element_type=jnp.float32) + b_ref[...]   # (Co, HWp)

    acc = jnp.zeros((Co, HWp), jnp.float32)
    for s in range(S):  # S is small & static -> fully unrolled at trace time
        out_s = base + jnp.dot(ws_ref[...], sp_ref[0, s],
                               preferred_element_type=jnp.float32)    # (Co, HWp)
        inter_ref[0, s] = out_s.astype(inter_ref.dtype)
        acc = acc + out_s

    agg_ref[0] = (acc * (1.0 / S)).astype(agg_ref.dtype)


def cross_op(target, support, weight, bias):
    """Pallas implementation of CrossOp.forward.

    target : [B, T=1, C, H, W]  (NCHW per group, like the PyTorch module)
    support: [B, S,   C, H, W]
    weight : [Co, 2C, K, K]     bias: [Co]
    Returns (aggregated [B, 1, Co, H, W], interactions [B, S, Co, H, W]).
    """
    B, T, C, H, W = target.shape
    _, S, _, _, _ = support.shape
    if T != 1:
        # torch .squeeze(dim=1) only collapses T when T == 1; CrossOp uses T == 1.
        raise ValueError("cross_op kernel supports target_group T == 1")
    if S < 1:
        raise ValueError("need at least one support")
    Co, twoC, K, K2 = weight.shape
    assert twoC == 2 * C and K == K2
    pad = K // 2
    HW = H * W
    KKC = K * K * C
    # Lane-pad spatial axis so all stores are unmasked full-width vst.
    HWp = ((HW + 127) // 128) * 128

    # --- im2col (layout plumbing, done once outside the kernel) -------------
    def im2col(x):  # (N, C, H, W) -> (N, K*K*C, HWp), tap-major / channel-minor
        xp = jnp.pad(x, ((0, 0), (0, 0), (pad, pad), (pad, pad)))
        taps = [xp[:, :, kh:kh + H, kw:kw + W]
                for kh in range(K) for kw in range(K)]          # each (N, C, H, W)
        p = jnp.stack(taps, axis=1).reshape(x.shape[0], KKC, HW)
        if HWp != HW:
            p = jnp.pad(p, ((0, 0), (0, 0), (0, HWp - HW)))
        return p

    tgt_patches = im2col(target[:, 0])                                   # (B, KKC, HWp)
    sup_patches = im2col(support.reshape(B * S, C, H, W)).reshape(B, S, KKC, HWp)

    # weight [Co, 2C, K, K] -> two (Co, K*K*C) halves matching patch ordering.
    w_t = jnp.transpose(weight[:, :C], (0, 2, 3, 1)).reshape(Co, KKC)
    w_s = jnp.transpose(weight[:, C:], (0, 2, 3, 1)).reshape(Co, KKC)
    b2 = bias.reshape(Co, 1)

    inter, agg = pl.pallas_call(
        _cross_op_kernel,
        out_shape=[
            jax.ShapeDtypeStruct((B, S, Co, HWp), jnp.float32),
            jax.ShapeDtypeStruct((B, Co, HWp), jnp.float32),
        ],
        grid=(B,),
        in_specs=[
            pl.BlockSpec((1, KKC, HWp), lambda b: (b, 0, 0)),
            pl.BlockSpec((1, S, KKC, HWp), lambda b: (b, 0, 0, 0)),
            pl.BlockSpec((Co, KKC), lambda b: (0, 0)),   # constant -> stays resident
            pl.BlockSpec((Co, KKC), lambda b: (0, 0)),
            pl.BlockSpec((Co, 1), lambda b: (0, 0)),
        ],
        out_specs=[
            pl.BlockSpec((1, S, Co, HWp), lambda b: (b, 0, 0, 0)),
            pl.BlockSpec((1, Co, HWp), lambda b: (b, 0, 0)),
        ],
        compiler_params=pltpu.CompilerParams(
            dimension_semantics=("parallel",)),
    )(tgt_patches, sup_patches, w_t, w_s, b2)

    if HWp != HW:
        inter = inter[..., :HW]
        agg = agg[..., :HW]

    # (Co, H*W) is already NCHW order: only reshapes, no wrapper transposes.
    interactions = inter.reshape(B, S, Co, H, W)
    aggregated = agg.reshape(B, 1, Co, H, W)
    return aggregated, interactions


def _reference(target, support, weight, bias):
    """Pure-JAX reference matching the PyTorch CrossOp semantics (T == 1)."""
    B, T, C, H, W = target.shape
    S = support.shape[1]
    exp_t = jnp.broadcast_to(target[:, :, None], (B, T, S, C, H, W))
    exp_s = jnp.broadcast_to(support[:, None], (B, T, S, C, H, W))
    flat = jnp.concatenate([exp_t, exp_s], axis=3).reshape(B * T * S, 2 * C, H, W)
    out = jax.lax.conv_general_dilated(
        flat, weight, window_strides=(1, 1), padding="SAME",
        dimension_numbers=("NCHW", "OIHW", "NCHW"))
    out = out + bias[None, :, None, None]
    out = out.reshape(B, T, S, -1, H, W)
    interactions = out[:, 0]                                  # squeeze(dim=1), T==1
    aggregated = interactions.mean(axis=1, keepdims=True)
    return aggregated, interactions


if __name__ == "__main__":
    B, T, S = 2, 1, 3
    C, Co, K = 4, 8, 3
    H = W = 16

    key = jax.random.PRNGKey(0)
    k_t, k_s, k_w, k_b = jax.random.split(key, 4)
    target = jax.random.normal(k_t, (B, T, C, H, W), jnp.float32)
    support = jax.random.normal(k_s, (B, S, C, H, W), jnp.float32)

    # Deterministic conv param init (PyTorch-style uniform bounds).
    fan_in = 2 * C * K * K
    bound = 1.0 / math.sqrt(fan_in)
    weight = jax.random.uniform(k_w, (Co, 2 * C, K, K), jnp.float32, -bound, bound)
    bias = jax.random.uniform(k_b, (Co,), jnp.float32, -bound, bound)

    agg, inter = jax.block_until_ready(cross_op(target, support, weight, bias))

    ref_agg, ref_inter = _reference(target, support, weight, bias)
    np.testing.assert_allclose(np.asarray(inter), np.asarray(ref_inter),
                               rtol=1e-4, atol=1e-4)
    np.testing.assert_allclose(np.asarray(agg), np.asarray(ref_agg),
                               rtol=1e-4, atol=1e-4)
    print("KERNEL_OK")
</pallas_src>

<mosaic_0001>
module attributes {stable_mosaic.version = 11 : i64} {
  func.func @_cross_op_kernel(%arg0: i32, %arg1: memref<1x36x256xf32, #tpu.memory_space<vmem>>, %arg2: memref<1x3x36x256xf32, #tpu.memory_space<vmem>>, %arg3: memref<8x36xf32, #tpu.memory_space<vmem>>, %arg4: memref<8x36xf32, #tpu.memory_space<vmem>>, %arg5: memref<8x1xf32, #tpu.memory_space<vmem>>, %arg6: memref<1x3x8x256xf32, #tpu.memory_space<vmem>>, %arg7: memref<1x8x256xf32, #tpu.memory_space<vmem>>) attributes {dimension_semantics = [#tpu.dimension_semantics<parallel>], iteration_bounds = array<i64: 2>, scalar_prefetch = 0 : i64, scratch_operands = 0 : i64, tpu.core_type = #tpu.core_type<tc>, window_params = [{transform_indices = @transform_0, window_bounds = array<i64: 1, 36, 256>}, {transform_indices = @transform_1, window_bounds = array<i64: 1, 3, 36, 256>}, {pipeline_mode = #tpu.pipeline_mode<synchronous>, transform_indices = @transform_2, window_bounds = array<i64: 8, 36>}, {pipeline_mode = #tpu.pipeline_mode<synchronous>, transform_indices = @transform_3, window_bounds = array<i64: 8, 36>}, {pipeline_mode = #tpu.pipeline_mode<synchronous>, transform_indices = @transform_4, window_bounds = array<i64: 8, 1>}, {transform_indices = @transform_5, window_bounds = array<i64: 1, 3, 8, 256>}, {transform_indices = @transform_6, window_bounds = array<i64: 1, 8, 256>}]} {
    %c0 = arith.constant 0 : index
    %c0_0 = arith.constant 0 : index
    %0 = vector.load %arg3[%c0, %c0_0] : memref<8x36xf32, #tpu.memory_space<vmem>>, vector<8x36xf32>
    %c0_1 = arith.constant 0 : index
    %c0_2 = arith.constant 0 : index
    %c0_3 = arith.constant 0 : index
    %1 = vector.load %arg1[%c0_1, %c0_2, %c0_3] : memref<1x36x256xf32, #tpu.memory_space<vmem>>, vector<1x36x256xf32>
    %2 = vector.shape_cast %1 : vector<1x36x256xf32> to vector<36x256xf32>
    %cst = arith.constant dense<0.000000e+00> : vector<8x256xf32>
    %3 = tpu.matmul %0, %2, %cst {dimension_numbers = #tpu.dot_dimension_numbers<[1], [0], [0], [1], [0, 0, 1, 1], [], []>} : vector<8x36xf32>, vector<36x256xf32>, vector<8x256xf32> -> vector<8x256xf32>
    %c0_4 = arith.constant 0 : index
    %c0_5 = arith.constant 0 : index
    %4 = vector.load %arg5[%c0_4, %c0_5] : memref<8x1xf32, #tpu.memory_space<vmem>>, vector<8x1xf32>
    %5 = vector.broadcast %4 : vector<8x1xf32> to vector<8x256xf32>
    %6 = arith.addf %3, %5 : vector<8x256xf32>
    %cst_6 = arith.constant 0.000000e+00 : f32
    %7 = vector.broadcast %cst_6 : f32 to vector<8x256xf32>
    %c0_7 = arith.constant 0 : index
    %c0_8 = arith.constant 0 : index
    %8 = vector.load %arg4[%c0_7, %c0_8] : memref<8x36xf32, #tpu.memory_space<vmem>>, vector<8x36xf32>
    %c0_9 = arith.constant 0 : index
    %c0_10 = arith.constant 0 : index
    %c0_11 = arith.constant 0 : index
    %c0_12 = arith.constant 0 : index
    %9 = vector.load %arg2[%c0_9, %c0_10, %c0_11, %c0_12] : memref<1x3x36x256xf32, #tpu.memory_space<vmem>>, vector<1x1x36x256xf32>
    %10 = vector.shape_cast %9 : vector<1x1x36x256xf32> to vector<36x256xf32>
    %cst_13 = arith.constant dense<0.000000e+00> : vector<8x256xf32>
    %11 = tpu.matmul %8, %10, %cst_13 {dimension_numbers = #tpu.dot_dimension_numbers<[1], [0], [0], [1], [0, 0, 1, 1], [], []>} : vector<8x36xf32>, vector<36x256xf32>, vector<8x256xf32> -> vector<8x256xf32>
    %12 = arith.addf %6, %11 : vector<8x256xf32>
    %c0_14 = arith.constant 0 : index
    %c0_15 = arith.constant 0 : index
    %c0_16 = arith.constant 0 : index
    %c0_17 = arith.constant 0 : index
    %13 = vector.load %arg6[%c0_14, %c0_15, %c0_16, %c0_17] : memref<1x3x8x256xf32, #tpu.memory_space<vmem>>, vector<1x1x8x256xf32>
    %14 = vector.shape_cast %13 : vector<1x1x8x256xf32> to vector<8x256xf32>
    %15 = vector.shape_cast %12 : vector<8x256xf32> to vector<1x1x8x256xf32>
    tpu.vector_store %arg6[%c0_14, %c0_15, %c0_16, %c0_17], %15 {strides = array<i32>} : memref<1x3x8x256xf32, #tpu.memory_space<vmem>>, vector<1x1x8x256xf32>,
    %16 = arith.addf %7, %12 : vector<8x256xf32>
    %c0_18 = arith.constant 0 : index
    %c0_19 = arith.constant 0 : index
    %17 = vector.load %arg4[%c0_18, %c0_19] : memref<8x36xf32, #tpu.memory_space<vmem>>, vector<8x36xf32>
    %c0_20 = arith.constant 0 : index
    %c1 = arith.constant 1 : index
    %c0_21 = arith.constant 0 : index
    %c0_22 = arith.constant 0 : index
    %18 = vector.load %arg2[%c0_20, %c1, %c0_21, %c0_22] : memref<1x3x36x256xf32, #tpu.memory_space<vmem>>, vector<1x1x36x256xf32>
    %19 = vector.shape_cast %18 : vector<1x1x36x256xf32> to vector<36x256xf32>
    %cst_23 = arith.constant dense<0.000000e+00> : vector<8x256xf32>
    %20 = tpu.matmul %17, %19, %cst_23 {dimension_numbers = #tpu.dot_dimension_numbers<[1], [0], [0], [1], [0, 0, 1, 1], [], []>} : vector<8x36xf32>, vector<36x256xf32>, vector<8x256xf32> -> vector<8x256xf32>
    %21 = arith.addf %6, %20 : vector<8x256xf32>
    %c0_24 = arith.constant 0 : index
    %c1_25 = arith.constant 1 : index
    %c0_26 = arith.constant 0 : index
    %c0_27 = arith.constant 0 : index
    %22 = vector.load %arg6[%c0_24, %c1_25, %c0_26, %c0_27] : memref<1x3x8x256xf32, #tpu.memory_space<vmem>>, vector<1x1x8x256xf32>
    %23 = vector.shape_cast %22 : vector<1x1x8x256xf32> to vector<8x256xf32>
    %24 = vector.shape_cast %21 : vector<8x256xf32> to vector<1x1x8x256xf32>
    tpu.vector_store %arg6[%c0_24, %c1_25, %c0_26, %c0_27], %24 {strides = array<i32>} : memref<1x3x8x256xf32, #tpu.memory_space<vmem>>, vector<1x1x8x256xf32>,
    %25 = arith.addf %16, %21 : vector<8x256xf32>
    %c0_28 = arith.constant 0 : index
    %c0_29 = arith.constant 0 : index
    %26 = vector.load %arg4[%c0_28, %c0_29] : memref<8x36xf32, #tpu.memory_space<vmem>>, vector<8x36xf32>
    %c0_30 = arith.constant 0 : index
    %c2 = arith.constant 2 : index
    %c0_31 = arith.constant 0 : index
    %c0_32 = arith.constant 0 : index
    %27 = vector.load %arg2[%c0_30, %c2, %c0_31, %c0_32] : memref<1x3x36x256xf32, #tpu.memory_space<vmem>>, vector<1x1x36x256xf32>
    %28 = vector.shape_cast %27 : vector<1x1x36x256xf32> to vector<36x256xf32>
    %cst_33 = arith.constant dense<0.000000e+00> : vector<8x256xf32>
    %29 = tpu.matmul %26, %28, %cst_33 {dimension_numbers = #tpu.dot_dimension_numbers<[1], [0], [0], [1], [0, 0, 1, 1], [], []>} : vector<8x36xf32>, vector<36x256xf32>, vector<8x256xf32> -> vector<8x256xf32>
    %30 = arith.addf %6, %29 : vector<8x256xf32>
    %c0_34 = arith.constant 0 : index
    %c2_35 = arith.constant 2 : index
    %c0_36 = arith.constant 0 : index
    %c0_37 = arith.constant 0 : index
    %31 = vector.load %arg6[%c0_34, %c2_35, %c0_36, %c0_37] : memref<1x3x8x256xf32, #tpu.memory_space<vmem>>, vector<1x1x8x256xf32>
    %32 = vector.shape_cast %31 : vector<1x1x8x256xf32> to vector<8x256xf32>
    %33 = vector.shape_cast %30 : vector<8x256xf32> to vector<1x1x8x256xf32>
    tpu.vector_store %arg6[%c0_34, %c2_35, %c0_36, %c0_37], %33 {strides = array<i32>} : memref<1x3x8x256xf32, #tpu.memory_space<vmem>>, vector<1x1x8x256xf32>,
    %34 = arith.addf %25, %30 : vector<8x256xf32>
    %cst_38 = arith.constant 0.333333343 : f32
    %35 = vector.broadcast %cst_38 : f32 to vector<8x256xf32>
    %36 = arith.mulf %34, %35 : vector<8x256xf32>
    %c0_39 = arith.constant 0 : index
    %c0_40 = arith.constant 0 : index
    %c0_41 = arith.constant 0 : index
    %37 = vector.load %arg7[%c0_39, %c0_40, %c0_41] : memref<1x8x256xf32, #tpu.memory_space<vmem>>, vector<1x8x256xf32>
    %38 = vector.shape_cast %37 : vector<1x8x256xf32> to vector<8x256xf32>
    %39 = vector.shape_cast %36 : vector<8x256xf32> to vector<1x8x256xf32>
    tpu.vector_store %arg7[%c0_39, %c0_40, %c0_41], %39 {strides = array<i32>} : memref<1x8x256xf32, #tpu.memory_space<vmem>>, vector<1x8x256xf32>,
    return
  }
  func.func @transform_0(%arg0: i32) -> (i32, i32, i32) {
    %c0_i32 = arith.constant 0 : i32
    %c0_i32_0 = arith.constant 0 : i32
    %c0_i32_1 = arith.constant 0 : i32
    return %arg0, %c0_i32, %c0_i32_0 : i32, i32, i32
  }
  func.func @transform_1(%arg0: i32) -> (i32, i32, i32, i32) {
    %c0_i32 = arith.constant 0 : i32
    %c0_i32_0 = arith.constant 0 : i32
    %c0_i32_1 = arith.constant 0 : i32
    %c0_i32_2 = arith.constant 0 : i32
    return %arg0, %c0_i32, %c0_i32_0, %c0_i32_1 : i32, i32, i32, i32
  }
  func.func @transform_2(%arg0: i32) -> (i32, i32) {
    %c0_i32 = arith.constant 0 : i32
    %c0_i32_0 = arith.constant 0 : i32
    %c0_i32_1 = arith.constant 0 : i32
    return %c0_i32, %c0_i32_0 : i32, i32
  }
  func.func @transform_3(%arg0: i32) -> (i32, i32) {
    %c0_i32 = arith.constant 0 : i32
    %c0_i32_0 = arith.constant 0 : i32
    %c0_i32_1 = arith.constant 0 : i32
    return %c0_i32, %c0_i32_0 : i32, i32
  }
  func.func @transform_4(%arg0: i32) -> (i32, i32) {
    %c0_i32 = arith.constant 0 : i32
    %c0_i32_0 = arith.constant 0 : i32
    %c0_i32_1 = arith.constant 0 : i32
    return %c0_i32, %c0_i32_0 : i32, i32
  }
  func.func @transform_5(%arg0: i32) -> (i32, i32, i32, i32) {
    %c0_i32 = arith.constant 0 : i32
    %c0_i32_0 = arith.constant 0 : i32
    %c0_i32_1 = arith.constant 0 : i32
    %c0_i32_2 = arith.constant 0 : i32
    return %arg0, %c0_i32, %c0_i32_0, %c0_i32_1 : i32, i32, i32, i32
  }
  func.func @transform_6(%arg0: i32) -> (i32, i32, i32) {
    %c0_i32 = arith.constant 0 : i32
    %c0_i32_0 = arith.constant 0 : i32
    %c0_i32_1 = arith.constant 0 : i32
    return %arg0, %c0_i32, %c0_i32_0 : i32, i32, i32
  }
}

</mosaic_0001>

<bundles_post_ra>
// kernel: tpu_custom_call.1
= control target key start
LH: loop header
LB: loop body
LE: loop exit
PB: predicated region body
PF: predicated region fallthrough
CT: control target
= control target key end

     0   :  { %s1258_s0 = inlined_call_operand.vmem [shape: f32[2,36,256], index: 0, kind: input, shape index: {}]   ;;  %s1259_s1 = inlined_call_operand.vmem [shape: f32[2,3,36,256], index: 1, kind: input, shape index: {}]   ;;  %s1260_s2 = inlined_call_operand.vmem [shape: f32[8,36], index: 2, kind: input, shape index: {}]   ;;  %s1261_s3 = inlined_call_operand.vmem [shape: f32[8,36], index: 3, kind: input, shape index: {}]   ;;  %s1262_s4 = inlined_call_operand.vmem [shape: f32[8,1], index: 4, kind: input, shape index: {}]   ;;  %s1263_s5 = inlined_call_operand.hbm [shape: f32[2,3,8,256], index: 5, kind: output, shape index: {0}]   ;;  %s1264_s6 = inlined_call_operand.hbm [shape: f32[2,8,256], index: 6, kind: output, shape index: {1}]  }
   0x1   :  { %1265 = sst [smem:[#allocation8_spill]] %s1258_s0 }
   0x2   :  { %12 = vsyncpa [#allocation3], 0 }
   0x3   :  { %14 = vsyncpa [#allocation3 + $0x1], 0 }
   0x4   :  { %15 = vsyncpa [#allocation5], 0 }
   0x5   :  { %17 = vsyncpa [#allocation5 + $0x1], 0  ;;  %s1054_s21 = smov 0   ;;  %s1056_s22 = smov 0  }
   0x6   :  { %s1058_s23 = smov 0   ;;  %s1060_s24 = smov 0  }
   0x7 LB: > { %s1075_s25 = sadd.s32 4294967295, %s1011_s24   ;;  %s818_s26 = sadd.s32 4294967294, %s1011_s24   ;;  %s1011_s24 = sphi %s1060_s24, %s1273_s24   ;;  %s1007_s23 = sphi %s1058_s23, %s1272_s23   ;;  %s1003_s22 = sphi %s1056_s22, %s1271_s22   ;;  %s999_s21 = sphi %s1054_s21, %s1270_s21  }
   0x8   : > { %s1079_s27 = sadd.s32 1, %s1011_s24   ;;  %s145_s28 = sadd.s32 1, %s1007_s23 }
   0x9   : > { %s142_s29 = ssub.s32 %s1011_s24, %s1079_s27  ;;  %p155_p0 = scmp.ne.s32.totalorder %s1007_s23, %s1003_s22 }
   0xa   : > { %p143_p1 = scmp.eq.s32.totalorder %s142_s29, 0  ;;  %p156_p2 = scmp.eq.s32.totalorder %s1075_s25, 1 }
   0xb   : > { %p161_p3 = scmp.ne.s32.totalorder %s1003_s22, %s999_s21  ;;  %p162_p4 = scmp.eq.s32.totalorder %s818_s26, 1 }
   0xc   : > { %s1090_s30 = scalar_select %p143_p1, %s1007_s23, %s145_s28  }
   0xd   : > { %p1092_p5 = por %p156_p2, %p155_p0  ;;  %p1096_p6 = por %p162_p4, %p161_p3 }
   0xe   : > { %p821_p7 = scmp.ge.s32.totalorder %s1011_s24, 1  ;;  %p231_p8 = scmp.lt.s32.totalorder %s1011_s24, 3 }
  0x10   : > { %p232_p9 = pnand %p821_p7, %p231_p8 }
  0x11   : > { %p271_p10 = scmp.lt.s32.totalorder (!%p232_p9), %s1075_s25, 1  ;;  %s1268_s0 = sld [smem:[#allocation8_spill]] (!%p232_p9) }
  0x12   : > { %235 = sbr.rel (%p232_p9) target bundleno = 287 (0x11f), region = 40  ;;  %s1180_s9 = sand.u32 (!%p232_p9), 1, %s1003_s22  }
  0x13   : > { %s868_s10 = smul.u32 (!%p232_p9), 48, %s1180_s9  ;;  %s867_s18 = sshll.u32 (!%p232_p9), %s1075_s25, 8 }
  0x14   : > { %s871_s14 = smul.u32 (!%p232_p9), 768, %s1075_s25  ;;  %s680_s26 = scalar_lea.sflag (!%p232_p9), [#allocation3], %s1180_s9 }
  0x15   : > { %s1015_s29 = smov (!%p232_p9), [#allocation2]  }
  0x16   : > { %s1190_s17 = scalar_lea.hbm (!%p232_p9), %s1263_s5, %s871_s14 }
  0x17   : > { %v1013_v0 = vmov 0.0   ;;  %v292_v1 = vld [vmem:[%s1262_s4] sm:$0xff]  ;;  %s272_s11 = scalar_select %p271_p10, %s1075_s25, 1  ;;  %v1014_v2 = vmov 0   ;;  %vm302_vm0 = vcmask 1043456   ;;  %vm298_vm1 = vcmask 293888  }
  0x18   : > { %373 = vmatprep.mubr.f32.mxu0 %v1013_v0  ;;  %464 = vmatprep.mubr.f32.mxu1 %v1013_v0  ;;  %v281_v23 = vld [vmem:[%s1260_s2] sm:$0xff] }
  0x19   : > { %920 = vset.pattern.permute.xlu0 %v1014_v2  ;;  %s869_s12 = smul.u32 80, %s272_s11  ;;  %v380_v26 = vld [vmem:[%s1261_s3] sm:$0xff] }
  0x1a   : > { %295 = vperm.xlu0 %920, %v292_v1   ;;  %s870_s13 = smul.u32 240, %s272_s11  ;;  %s263_s11 = scalar_lea.vmem [#allocation2], %s868_s10 }
  0x1b   : > { %s1112_s16 = scalar_lea.vmem %s1268_s0, %s869_s12  ;;  %s698_s12 = sshll.u32 %s263_s11, 4  ;;  %s1185_s12 = int_to_ptr.vmem [resolvable:$true] %s698_s12 }
  0x1c   : > { %s1117_s19 = scalar_lea.vmem %s1259_s1, %s870_s13  ;;  %v291_v3 = vld [vmem:[%s1112_s16 + $0x48] sm:$0xf]  ;;  %v290_v4 = vld [vmem:[%s1112_s16 + $0x40] sm:$0xf]  ;;  %v289_v5 = vld [vmem:[%s1112_s16 + $0x38] sm:$0xff]  ;;  %s822_s13 = sshll.u32 %s1180_s9, 4 }
  0x1d   : > { %825 = vmatprep.subr.msk.mxu0 %vm302_vm0, %v291_v3  ;;  %v390_v6 = vld [vmem:[%s1117_s19 + $0x48] sm:$0xf]  ;;  %v389_v7 = vld [vmem:[%s1117_s19 + $0x40] sm:$0xf]  ;;  %v388_v8 = vld [vmem:[%s1117_s19 + $0x38] sm:$0xff]  ;;  %s921_s28 = scalar_lea.vmem %s1185_s12, 768 }
  0x1e   : > { %828 = vmatprep.subr.msk.mxu1 %vm302_vm0, %v390_v6  ;;  %826 = vmatpush1.msk.msra.mxu0 %vm302_vm0, %v290_v4  ;;  %v288_v9 = vld [vmem:[%s1112_s16 + $0x30] sm:$0xff]  ;;  %v287_v11 = vld [vmem:[%s1112_s16 + $0x28] sm:$0xff]  ;;  %v286_v13 = vld [vmem:[%s1112_s16 + $0x20] sm:$0xff]  ;;  %p922_p11 = scmp.ne.s32.totalorder %s1185_s12, %s921_s28  ;;  %s925_s10 = sshll.u32 %s1015_s29, 4  ;;  %s926_s10 = int_to_ptr.vmem [resolvable:$false] %s925_s10 }
  0x1f   : > { %v387_v10 = vld [vmem:[%s1117_s19 + $0x30] sm:$0xff]  ;;  %829 = vmatpush1.msk.msra.mxu1 %vm302_vm0, %v389_v7  ;;  %333 = vmatprep.subr.mxu0 %v289_v5  ;;  %v386_v12 = vld [vmem:[%s1117_s19 + $0x28] sm:$0xff]  ;;  %v385_v14 = vld [vmem:[%s1117_s19 + $0x20] sm:$0xff]  ;;  %s927_s14 = scalar_lea.vmem %s926_s10, 1536  ;;  %p928_p0 = scmp.lt.s32.totalorder %s1185_s12, %s926_s10 }
  0x20   : > { %424 = vmatprep.subr.mxu1 %v388_v8  ;;  %334 = vmatpush1.msra.mxu0 %v288_v9  ;;  %v285_v15 = vld [vmem:[%s1112_s16 + $0x18] sm:$0xff]  ;;  %v284_v17 = vld [vmem:[%s1112_s16 + $0x10] sm:$0xff]  ;;  %v283_v19 = vld [vmem:[%s1112_s16 + $0x8] sm:$0xff]  ;;  %p923_p12 = pnand %p922_p11, %p1092_p5  ;;  %p929_p1 = scmp.lt.s32.totalorder %s927_s14, %s921_s28 }
  0x21   : > { %425 = vmatpush1.msra.mxu1 %v387_v10  ;;  %335 = vmatprep.subr.mxu0 %v287_v11  ;;  %v384_v16 = vld [vmem:[%s1117_s19 + $0x18] sm:$0xff]  ;;  %v383_v18 = vld [vmem:[%s1117_s19 + $0x10] sm:$0xff]  ;;  %v382_v20 = vld [vmem:[%s1117_s19 + $0x8] sm:$0xff] }
  0x22   : > { %426 = vmatprep.subr.mxu1 %v386_v12  ;;  %336 = vmatpush1.msra.mxu0 %v286_v13  ;;  %v282_v21 = vld [vmem:[%s1112_s16] sm:$0xff]  ;;  %v840_v24 = vld [vmem:[%s1117_s19 + $0x98] sm:$0xf]  ;;  %v855_v25 = vld [vmem:[%s1117_s19 + $0xe8] sm:$0xf]  ;;  %p924_p13 = pneg %p923_p12  ;;  %p930_p2 = por %p929_p1, %p928_p0 }
  0x23   : > { %427 = vmatpush1.msra.mxu1 %v385_v14  ;;  %337 = vmatprep.subr.mxu0 %v285_v15  ;;  %v381_v22 = vld [vmem:[%s1117_s19] sm:$0xff]  ;;  %v839_v27 = vld [vmem:[%s1117_s19 + $0x90] sm:$0xf]  ;;  %v838_v29 = vld [vmem:[%s1117_s19 + $0x88] sm:$0xff] }
  0x24   : > { %428 = vmatprep.subr.mxu1 %v384_v16  ;;  %338 = vmatpush1.msra.mxu0 %v284_v17  ;;  %v854_v28 = vld [vmem:[%s1117_s19 + $0xe0] sm:$0xf]  ;;  %v853_v30 = vld [vmem:[%s1117_s19 + $0xd8] sm:$0xff]  ;;  %v852_v32 = vld [vmem:[%s1117_s19 + $0xd0] sm:$0xff]  ;;  %p931_p3 = pnand %p930_p2, %p924_p13 }
  0x25   : > { %429 = vmatpush1.msra.mxu1 %v383_v18  ;;  %339 = vmatprep.subr.mxu0 %v283_v19  ;;  %v837_v31 = vld [vmem:[%s1117_s19 + $0x80] sm:$0xff]  ;;  %v836_v33 = vld [vmem:[%s1117_s19 + $0x78] sm:$0xff]  ;;  %v851_v34 = vld [vmem:[%s1117_s19 + $0xc8] sm:$0xff] }
  0x26   : > { %430 = vmatprep.subr.mxu1 %v382_v20  ;;  %340 = vmatpush1.msra.mxu0 %v282_v21  ;;  %v835_v35 = vld [vmem:[%s1117_s19 + $0x70] sm:$0xff]  ;;  %v850_v36 = vld [vmem:[%s1117_s19 + $0xc0] sm:$0xff]  ;;  %v834_v37 = vld [vmem:[%s1117_s19 + $0x68] sm:$0xff] }
  0x27   : > { %431 = vmatpush1.msra.mxu1 %v381_v22  ;;  %827 = vmatmul.mubr.msk.f32.vlgmr.msra.gmra.mxu0 %vm298_vm1, %v281_v23  ;;  %v849_v38 = vld [vmem:[%s1117_s19 + $0xb8] sm:$0xff]  ;;  %v833_v39 = vld [vmem:[%s1117_s19 + $0x60] sm:$0xff]  ;;  %v848_v40 = vld [vmem:[%s1117_s19 + $0xb0] sm:$0xff] }
  0x28   : > { %841 = vmatprep.subr.msk.mxu0 %vm302_vm0, %v840_v24  ;;  %856 = vmatprep.subr.msk.mxu1 %vm302_vm0, %v855_v25  ;;  %v832_v41 = vld [vmem:[%s1117_s19 + $0x58] sm:$0xff]  ;;  %v847_v42 = vld [vmem:[%s1117_s19 + $0xa8] sm:$0xff]  ;;  %v831_v43 = vld [vmem:[%s1117_s19 + $0x50] sm:$0xff] }
  0x29   : > { %830 = vmatmul.mubr.msk.f32.vlgmr.msra.gmra.mxu1 %vm298_vm1, %v380_v26  ;;  %842 = vmatpush1.msk.msra.mxu0 %vm302_vm0, %v839_v27  ;;  %v846_v44 = vld [vmem:[%s1117_s19 + $0xa0] sm:$0xff]  ;;  %s1193_s19 = scalar_lea.vmem [#allocation4], %s822_s13 }
  0x2a   : > { %857 = vmatpush1.msk.msra.mxu1 %vm302_vm0, %v854_v28  ;;  %522 = vmatprep.subr.mxu0 %v838_v29 }
  0x2b   : > { %621 = vmatprep.subr.mxu1 %v853_v30  ;;  %523 = vmatpush1.msra.mxu0 %v837_v31 }
  0x2c   : > { %622 = vmatpush1.msra.mxu1 %v852_v32  ;;  %524 = vmatprep.subr.mxu0 %v836_v33 }
  0x2d   : > { %623 = vmatprep.subr.mxu1 %v851_v34  ;;  %525 = vmatpush1.msra.mxu0 %v835_v35 }
  0x2e   : > { %624 = vmatpush1.msra.mxu1 %v850_v36  ;;  %526 = vmatprep.subr.mxu0 %v834_v37 }
  0x2f   : > { %625 = vmatprep.subr.mxu1 %v849_v38  ;;  %527 = vmatpush1.msra.mxu0 %v833_v39 }
  0x30   : > { %626 = vmatpush1.msra.mxu1 %v848_v40  ;;  %528 = vmatprep.subr.mxu0 %v832_v41 }
  0x31   : > { %627 = vmatprep.subr.mxu1 %v847_v42  ;;  %529 = vmatpush1.msra.mxu0 %v831_v43 }
  0x32   : > { %562 = vmatprep.mubr.f32.mxu0 %v1013_v0  ;;  %628 = vmatpush1.msra.mxu1 %v846_v44 }
  0x33   : > { %661 = vmatprep.mubr.f32.mxu1 %v1013_v0  ;;  %843 = vmatmul.mubr.msk.f32.vlgmr.msra.gmra.mxu0 %vm298_vm1, %v380_v26 }
  0x34   : > { %858 = vmatmul.mubr.msk.f32.vlgmr.msra.gmra.mxu1 %vm298_vm1, %v380_v26 }
  0x95   : > { %v296_v45 = vpop.permute.xlu0 %295 }
  0xe7   : > { %v375_v46 = vpop.f32.mrf.mxu0 }
  0xe8   : > { %v376_v47 = vadd.f32 %v375_v46, %v296_v45 }
  0xe9   : > { %v466_v48 = vpop.f32.mrf.mxu1  ;;  %v377_v49 = vpop.f32.mrf.mxu0 }
  0xea   : > { %v471_v50 = vadd.f32 %v466_v48, %v376_v47  ;;  %v378_v51 = vadd.f32 %v377_v49, %v296_v45 }
  0xeb   : > { %v468_v52 = vpop.f32.mrf.mxu1 }
  0xec   : > { %473 = vst [vmem:[%s263_s11] sm:$0xff] %v471_v50  ;;  %v472_v53 = vadd.f32 %v468_v52, %v378_v51 }
  0xee   : > { %474 = vst [vmem:[%s263_s11 + $0x8] sm:$0xff] %v472_v53 }
  0xf3   : > { %v564_v54 = vpop.f32.mrf.mxu0 }
  0xf4   : > { %v569_v55 = vadd.f32 %v564_v54, %v376_v47  ;;  %v663_v56 = vpop.f32.mrf.mxu1 }
  0xf5   : > { %v668_v57 = vadd.f32 %v663_v56, %v376_v47  ;;  %v566_v58 = vpop.f32.mrf.mxu0 }
  0xf6   : > { %844 = vst [vmem:[%s263_s11 + $0x10] sm:$0xff] %v569_v55  ;;  %v574_v59 = vadd.f32 %v569_v55, %v471_v50  ;;  %v570_v60 = vadd.f32 %v566_v58, %v378_v51  ;;  %v665_v61 = vpop.f32.mrf.mxu1 }
  0xf7   : > { %859 = vst [vmem:[%s263_s11 + $0x20] sm:$0xff] %v668_v57  ;;  %v669_v62 = vadd.f32 %v665_v61, %v378_v51 }
  0xf8   : > { %v673_v63 = vadd.f32 %v668_v57, %v574_v59  ;;  %845 = vst [vmem:[%s263_s11 + $0x18] sm:$0xff] %v570_v60  ;;  %v575_v0 = vadd.f32 %v570_v60, %v472_v53 }
  0xf9   : > { %860 = vst [vmem:[%s263_s11 + $0x28] sm:$0xff] %v669_v62 }
  0xfa   : > { %v675_v1 = vmul.f32 0.33333334, %v673_v63  ;;  %v674_v2 = vadd.f32 %v669_v62, %v575_v0 }
  0xfb   : > { %934 = shalt.err (!%p931_p3)
}
  0xfc   : > { %s935_s11 = scalar_lea.hbm %s1190_s17, 768  ;;  %s939_s16 = scalar_lea.hbm %s1263_s5, 1536 }
  0xfd   : > { %p936_p4 = scmp.ne.s32.totalorder %s1190_s17, %s935_s11  ;;  %p940_p9 = scmp.lt.s32.totalorder %s1190_s17, %s1263_s5 }
  0xfe   : > { %p941_p10 = scmp.lt.s32.totalorder %s939_s16, %s935_s11 }
  0xff   : > { %p937_p7 = pnand %p936_p4, %p1092_p5 }
 0x100   : > { %p942_p11 = por %p941_p10, %p940_p9 }
 0x101   : > { %p938_p8 = pneg %p937_p7 }
 0x103   : > { %p943_p12 = pnand %p942_p11, %p938_p8 }
 0x105   : > { %946 = shalt.err (!%p943_p12)
}
 0x106   : > { %s1016_s28 = smov 256   ;;  %s1017_s10 = smov 16   ;;  %677 = vst [vmem:[%s1193_s19] sm:$0xff] %v675_v1  ;;  %v676_v3 = vmul.f32 0.33333334, %v674_v2 }
 0x107   : > { %872 = dma.vmem_to_hbm [thread:$0]  (%p1092_p5), %s1185_s12, 768, %s1190_s17, %s680_s26, %s1016_s28, %s1016_s28, %s1017_s10  }
 0x108   : > { %s713_s11 = scalar_lea.hbm %s1264_s6, %s867_s18  ;;  %s1269_s13 = sshll.u32 %s1193_s19, 4  ;;  %678 = vst [vmem:[%s1193_s19 + $0x8] sm:$0xff] %v676_v3  ;;  %s716_s13 = int_to_ptr.vmem [resolvable:$true] %s1269_s13 }
 0x109   : > { %s685_s15 = scalar_lea.sflag [#allocation5], %s1180_s9  ;;  %s947_s16 = scalar_lea.vmem %s716_s13, 256 }
 0x10a   : > { %p948_p13 = scmp.ne.s32.totalorder %s716_s13, %s947_s16  ;;  %s1018_s29 = smov [#allocation4]  }
 0x10b   : > { %s951_s0 = sshll.u32 %s1018_s29, 4  ;;  %s952_s0 = int_to_ptr.vmem [resolvable:$false] %s951_s0 }
 0x10c   : > { %p949_p0 = pnand %p948_p13, %p1092_p5  ;;  %s953_s12 = scalar_lea.vmem %s952_s0, 512 }
 0x10d   : > { %p954_p2 = scmp.lt.s32.totalorder %s716_s13, %s952_s0  ;;  %p955_p3 = scmp.lt.s32.totalorder %s953_s12, %s947_s16 }
 0x10e   : > { %p950_p1 = pneg %p949_p0 }
 0x10f   : > { %p956_p4 = por %p955_p3, %p954_p2 }
 0x111   : > { %p957_p7 = pnand %p956_p4, %p950_p1 }
 0x113   : > { %960 = shalt.err (!%p957_p7)
}
 0x114   : > { %s961_s25 = scalar_lea.hbm %s713_s11, 256  ;;  %s965_s18 = scalar_lea.hbm %s1264_s6, 512 }
 0x115   : > { %p962_p8 = scmp.ne.s32.totalorder %s713_s11, %s961_s25  ;;  %p966_p11 = scmp.lt.s32.totalorder %s713_s11, %s1264_s6 }
 0x116   : > { %p967_p12 = scmp.lt.s32.totalorder %s965_s18, %s961_s25 }
 0x117   : > { %p963_p9 = pnand %p962_p8, %p1092_p5 }
 0x118   : > { %p968_p13 = por %p967_p12, %p966_p11 }
 0x119   : > { %p964_p10 = pneg %p963_p9 }
 0x11b   : > { %p969_p0 = pnand %p968_p13, %p964_p10 }
 0x11d   : > { %972 = shalt.err (!%p969_p0)
}
 0x11e   : > { %873 = dma.vmem_to_hbm [thread:$0]  (%p1092_p5), %s716_s13, 256, %s713_s11, %s685_s15  }
 0x11f PF: > { %p883_p1 = scmp.ge.s32.totalorder %s1011_s24, 2  ;;  %s727_s0 = sand.u32 1, %s999_s21  }
 0x120   : > { %s728_s28 = scalar_lea.sflag [#allocation3], %s727_s0 }
 0x121   : > { %p877_p2 = pnand %p883_p1, %p1096_p6 }
 0x123   : > { %p878_p3 = pneg %p877_p2 }
 0x125   : > { %990 = dma.done.wait (%p878_p3), %s728_s28, 768  }
 0x126   : > { %992 = vsyncadd (%p878_p3), %s728_s28, 4294966528  ;;  %s737_s10 = scalar_lea.sflag [#allocation5], %s727_s0 }
 0x127   : > { %994 = dma.done.wait (%p878_p3), %s737_s10, 256  }
 0x128   : > { %996 = vsyncadd (%p878_p3), %s737_s10, 4294967040  ;;  %p20_p5 = scmp.ge.s32.totalorder %s1079_s27, 4   ;;  %s1270_s21 = smov %s1003_s22 }
 0x129   : > { %s1271_s22 = smov %s1007_s23  ;;  %s1272_s23 = smov %s1090_s30 }
 0x12a   : > { %s1273_s24 = smov %s1079_s27  ;;  %22 = sbr.rel (!%p20_p5) target bundleno = 7 (0x7), region = 99 }
 0x12f   :  { %742 = vsyncpa [#allocation3], 1 }
 0x130   :  { %744 = vsyncpa [#allocation3 + $0x1], 1 }
 0x131   :  { %745 = vsyncpa [#allocation5], 1 }
 0x132   :  { %747 = vsyncpa [#allocation5 + $0x1], 1 }

</bundles_post_ra>
